<compile_context>
chip_gen: v6e
topology: v6e:2x2x1
jax: 0.10.0
libtpu: 0.0.40
codegen_flags: <defaults>
</compile_context>

<pallas_src>
import functools

import jax
import jax.numpy as jnp
from jax import lax
from jax.experimental import pallas as pl
from jax.experimental.pallas import tpu as pltpu


def _round_up(x: int, m: int) -> int:
    return ((x + m - 1) // m) * m


def _judge_kernel(cs_ref, ctr_ref, w_ref, b_ref, out_ref):
    # cs_ref : (tc, D)  candidate rows for this (batch, tile), native dtype
    # ctr_ref: (D, 1)   this batch's key-mean center column (f32, batch-resident)
    # w_ref  : (D, D)   nn.Linear weight (D_out, D_in), resident across steps
    # b_ref  : (D, 1)   bias column (f32), resident across steps
    # out_ref: (1, tc)  lane-dense per-candidate inner products (f32)
    #
    # projT = W @ Cs^T — the Cs transpose is folded into the contraction
    # (no XLA transpose pass over HBM), keeping candidates on the lane axis.
    proj = lax.dot_general(
        w_ref[...], cs_ref[...],
        dimension_numbers=(((1,), (1,)), ((), ())),
        preferred_element_type=jnp.float32)                     # (D, tc) f32
    proj = jnp.maximum(proj + b_ref[...], 0.0)                  # bias + ReLU, f32
    # per-candidate inner product with the batch center:
    # VPU multiply (lane-broadcast of the (D,1) column) + sublane reduce (XLU)
    out_ref[...] = jnp.sum(proj * ctr_ref[...], axis=0, keepdims=True)


@functools.partial(jax.jit, static_argnames=("tile_cols",))
def inner_product_judge_net(Ks, Cs, W, bias, *, tile_cols=1024):
    """Ks: (B, n_keys, D), Cs: (B, n_cands, D), W: (D_out, D_in), bias: (D,)."""
    B, n_keys, D = Ks.shape
    _, n_cands, _ = Cs.shape

    # --- tiny wrapper-side prep ------------------------------------------
    # per-batch key centers, f32 accumulation, shaped as a column per batch
    centers = jnp.mean(Ks.astype(jnp.float32), axis=1)[..., None]   # (B, D, 1)

    # stream Cs in its native dtype (no forced f32 upcast); match W's dtype to it
    compute_dtype = Cs.dtype
    w_in = W.astype(compute_dtype)
    bias_col = bias.astype(jnp.float32).reshape(D, 1)

    # pad the candidate axis only up to the next multiple of 128 (lane alignment)
    nc_pad = _round_up(n_cands, 128)
    cs = Cs if nc_pad == n_cands else jnp.pad(
        Cs, ((0, 0), (0, nc_pad - n_cands), (0, 0)))

    # lane tile: largest multiple of 128 that divides nc_pad and is <= tile_cols;
    # when B == 1, cap it so the grid keeps >= 2 steps (v7x has 2 TensorCores).
    nblk = nc_pad // 128
    max_blk = max(1, min(tile_cols // 128, nblk))
    if B == 1 and nblk >= 2:
        max_blk = max(1, min(max_blk, nblk // 2))
    tb = max(d for d in range(1, max_blk + 1) if nblk % d == 0)
    tc = tb * 128
    grid = (B, nc_pad // tc)

    itemsize = jnp.dtype(compute_dtype).itemsize
    cost = pl.CostEstimate(
        flops=2 * D * D * B * nc_pad + 4 * D * B * nc_pad,
        transcendentals=0,
        bytes_accessed=(B * nc_pad * D * itemsize        # Cs stream (dominant)
                        + B * nc_pad * 4                 # output
                        + D * D * itemsize               # W (resident)
                        + B * D * 4 + D * 4),            # centers + bias
    )

    prod = pl.pallas_call(
        _judge_kernel,
        out_shape=jax.ShapeDtypeStruct((B, 1, nc_pad), jnp.float32),
        grid_spec=pltpu.PrefetchScalarGridSpec(
            num_scalar_prefetch=0,
            grid=grid,
            in_specs=[
                # candidates: row-major tiles, batch axis squeezed
                pl.BlockSpec((None, tc, D), lambda b, i: (b, i, 0)),
                # per-batch center column: resident for the whole batch
                pl.BlockSpec((None, D, 1), lambda b, i: (b, 0, 0)),
                # weight / bias: constant index_map -> resident across all steps
                pl.BlockSpec((D, D), lambda b, i: (0, 0)),
                pl.BlockSpec((D, 1), lambda b, i: (0, 0)),
            ],
            out_specs=pl.BlockSpec((None, 1, tc), lambda b, i: (b, 0, i)),
        ),
        compiler_params=pltpu.CompilerParams(
            dimension_semantics=("parallel", "parallel"),
            vmem_limit_bytes=32 * 1024 * 1024,
        ),
        cost_estimate=cost,
    )(cs, centers, w_in, bias_col)

    # epilogue in the wrapper: drop candidate padding + [p, -p] concat
    products = prod[:, 0, :n_cands][..., None]                    # (B, Nc, 1)
    return jnp.concatenate([products, -products], axis=-1)        # (B, Nc, 2)


def reference(Ks, Cs, W, bias):
    center = jnp.mean(Ks, axis=-2, keepdims=True)                 # (B, 1, D)
    proj = jax.nn.relu(jnp.einsum("bcd,ed->bce", Cs, W) + bias)   # (B, Nc, D)
    products = jnp.sum(proj * center, axis=-1, keepdims=True)     # (B, Nc, 1)
    return jnp.concatenate([products, -products], axis=-1)


if __name__ == "__main__":
    key = jax.random.PRNGKey(0)
    # small shapes: n_cands deliberately not a multiple of 128 to exercise the
    # 128-pad + tail-slice path; B=2 gives a 2-step "parallel" grid.
    B, n_keys, n_cands, D = 2, 8, 300, 128

    k_ks, k_cs, k_w, k_b = jax.random.split(key, 4)
    Ks = jax.random.normal(k_ks, (B, n_keys, D), dtype=jnp.float32)
    Cs = jax.random.normal(k_cs, (B, n_cands, D), dtype=jnp.float32)

    # nn.Linear(D, D): weight (D_out, D_in), bias (D_out,). Deterministic init.
    bound = 1.0 / (D ** 0.5)
    W = jax.random.uniform(k_w, (D, D), minval=-bound, maxval=bound,
                           dtype=jnp.float32)
    bias = jax.random.uniform(k_b, (D,), minval=-bound, maxval=bound,
                              dtype=jnp.float32)

    # f32 path (exact against the f32 reference)
    out = inner_product_judge_net(Ks, Cs, W, bias)
    out = jax.block_until_ready(out)
    ref = reference(Ks, Cs, W, bias)
    assert out.shape == (B, n_cands, 2), out.shape
    assert jnp.allclose(out, ref, atol=1e-4, rtol=1e-4), "f32 mismatch vs reference"

    # bf16 input path (streams half the bytes; loose tolerance vs f32 math)
    out_bf = inner_product_judge_net(Ks.astype(jnp.bfloat16),
                                     Cs.astype(jnp.bfloat16), W, bias)
    out_bf = jax.block_until_ready(out_bf)
    ref_bf = reference(Ks.astype(jnp.bfloat16).astype(jnp.float32),
                       Cs.astype(jnp.bfloat16).astype(jnp.float32), W, bias)
    assert jnp.allclose(out_bf, ref_bf, atol=1e-1, rtol=1e-1), "bf16 mismatch"

    print("KERNEL_OK")
</pallas_src>

<mosaic_0001>
module attributes {stable_mosaic.version = 11 : i64} {
  func.func @_judge_kernel(%arg0: i32, %arg1: i32, %arg2: memref<1x384x128xf32, #tpu.memory_space<vmem>>, %arg3: memref<1x128x1xf32, #tpu.memory_space<vmem>>, %arg4: memref<128x128xf32, #tpu.memory_space<vmem>>, %arg5: memref<128x1xf32, #tpu.memory_space<vmem>>, %arg6: memref<1x1x384xf32, #tpu.memory_space<vmem>>) attributes {dimension_semantics = [#tpu.dimension_semantics<parallel>, #tpu.dimension_semantics<parallel>], iteration_bounds = array<i64: 2, 1>, scalar_prefetch = 0 : i64, scratch_operands = 0 : i64, tpu.core_type = #tpu.core_type<tc>, window_params = [{transform_indices = @transform_0, window_bounds = array<i64: 1, 384, 128>}, {transform_indices = @transform_1, window_bounds = array<i64: 1, 128, 1>}, {pipeline_mode = #tpu.pipeline_mode<synchronous>, transform_indices = @transform_2, window_bounds = array<i64: 128, 128>}, {pipeline_mode = #tpu.pipeline_mode<synchronous>, transform_indices = @transform_3, window_bounds = array<i64: 128, 1>}, {transform_indices = @transform_4, window_bounds = array<i64: 1, 1, 384>}]} {
    %c0 = arith.constant 0 : index
    %c0_0 = arith.constant 0 : index
    %0 = vector.load %arg4[%c0, %c0_0] : memref<128x128xf32, #tpu.memory_space<vmem>>, vector<128x128xf32>
    %c0_1 = arith.constant 0 : index
    %c0_2 = arith.constant 0 : index
    %c0_3 = arith.constant 0 : index
    %1 = vector.load %arg2[%c0_1, %c0_2, %c0_3] : memref<1x384x128xf32, #tpu.memory_space<vmem>>, vector<1x384x128xf32>
    %2 = vector.shape_cast %1 : vector<1x384x128xf32> to vector<384x128xf32>
    %cst = arith.constant dense<0.000000e+00> : vector<128x384xf32>
    %3 = tpu.matmul %0, %2, %cst {dimension_numbers = #tpu.dot_dimension_numbers<[1], [1], [0], [0], [0, 0, 1, 0], [], []>} : vector<128x128xf32>, vector<384x128xf32>, vector<128x384xf32> -> vector<128x384xf32>
    %c0_4 = arith.constant 0 : index
    %c0_5 = arith.constant 0 : index
    %4 = vector.load %arg5[%c0_4, %c0_5] : memref<128x1xf32, #tpu.memory_space<vmem>>, vector<128x1xf32>
    %5 = vector.broadcast %4 : vector<128x1xf32> to vector<128x384xf32>
    %6 = arith.addf %3, %5 : vector<128x384xf32>
    %cst_6 = arith.constant 0.000000e+00 : f32
    %7 = vector.broadcast %cst_6 : f32 to vector<128x384xf32>
    %8 = arith.maximumf %6, %7 : vector<128x384xf32>
    %c0_7 = arith.constant 0 : index
    %c0_8 = arith.constant 0 : index
    %c0_9 = arith.constant 0 : index
    %9 = vector.load %arg3[%c0_7, %c0_8, %c0_9] : memref<1x128x1xf32, #tpu.memory_space<vmem>>, vector<1x128x1xf32>
    %10 = vector.shape_cast %9 : vector<1x128x1xf32> to vector<128x1xf32>
    %11 = vector.broadcast %10 : vector<128x1xf32> to vector<128x384xf32>
    %12 = arith.mulf %8, %11 : vector<128x384xf32>
    %cst_10 = arith.constant dense<0.000000e+00> : vector<384xf32>
    %13 = vector.multi_reduction <add>, %12, %cst_10 [0] : vector<128x384xf32> to vector<384xf32>
    %14 = vector.shape_cast %13 : vector<384xf32> to vector<1x384xf32>
    %c0_11 = arith.constant 0 : index
    %c0_12 = arith.constant 0 : index
    %c0_13 = arith.constant 0 : index
    %15 = vector.load %arg6[%c0_11, %c0_12, %c0_13] : memref<1x1x384xf32, #tpu.memory_space<vmem>>, vector<1x1x384xf32>
    %16 = vector.shape_cast %15 : vector<1x1x384xf32> to vector<1x384xf32>
    %17 = vector.shape_cast %14 : vector<1x384xf32> to vector<1x1x384xf32>
    tpu.vector_store %arg6[%c0_11, %c0_12, %c0_13], %17 {strides = array<i32>} : memref<1x1x384xf32, #tpu.memory_space<vmem>>, vector<1x1x384xf32>,
    return
  }
  func.func @transform_0(%arg0: i32, %arg1: i32) -> (i32, i32, i32) {
    %c0_i32 = arith.constant 0 : i32
    %c0_i32_0 = arith.constant 0 : i32
    return %arg0, %arg1, %c0_i32 : i32, i32, i32
  }
  func.func @transform_1(%arg0: i32, %arg1: i32) -> (i32, i32, i32) {
    %c0_i32 = arith.constant 0 : i32
    %c0_i32_0 = arith.constant 0 : i32
    %c0_i32_1 = arith.constant 0 : i32
    return %arg0, %c0_i32, %c0_i32_0 : i32, i32, i32
  }
  func.func @transform_2(%arg0: i32, %arg1: i32) -> (i32, i32) {
    %c0_i32 = arith.constant 0 : i32
    %c0_i32_0 = arith.constant 0 : i32
    %c0_i32_1 = arith.constant 0 : i32
    return %c0_i32, %c0_i32_0 : i32, i32
  }
  func.func @transform_3(%arg0: i32, %arg1: i32) -> (i32, i32) {
    %c0_i32 = arith.constant 0 : i32
    %c0_i32_0 = arith.constant 0 : i32
    %c0_i32_1 = arith.constant 0 : i32
    return %c0_i32, %c0_i32_0 : i32, i32
  }
  func.func @transform_4(%arg0: i32, %arg1: i32) -> (i32, i32, i32) {
    %c0_i32 = arith.constant 0 : i32
    %c0_i32_0 = arith.constant 0 : i32
    return %arg0, %c0_i32, %arg1 : i32, i32, i32
  }
}

</mosaic_0001>

<bundles_post_ra>
// kernel: inner_product_judge_net.1
= control target key start
LH: loop header
LB: loop body
LE: loop exit
PB: predicated region body
PF: predicated region fallthrough
CT: control target
= control target key end

     0   :  { %s1345_s15 = smov 0   ;;  %s1347_s16 = smov 0   ;;  %s1710_s0 = inlined_call_operand.vmem [shape: f32[2,384,128], index: 0, kind: input, shape index: {}]   ;;  %s1711_s1 = inlined_call_operand.vmem [shape: f32[2,128,1], index: 1, kind: input, shape index: {}]   ;;  %s1712_s2 = inlined_call_operand.vmem [shape: f32[128,128], index: 2, kind: input, shape index: {}]   ;;  %s1713_s3 = inlined_call_operand.vmem [shape: f32[128,1], index: 3, kind: input, shape index: {}]   ;;  %s1714_s4 = inlined_call_operand.vmem [shape: f32[2,1,384], index: 4, kind: output, shape index: {}]  }
   0x1   :  { %s1349_s17 = smov 0  }
   0x2 LB: > { %s26_s18 = sadd.s32 1, %s1312_s16  ;;  %p1105_p0 = scmp.ge.s32.totalorder %s1316_s17, 1  ;;  %s1316_s17 = sphi %s1349_s17, %s14_s17   ;;  %s1312_s16 = sphi %s1347_s16, %s1716_s16   ;;  %s1308_s15 = sphi %s1345_s15, %s1715_s15  }
   0x3   : > { %p28_p1 = scmp.ge.s32.totalorder %s26_s18, 2  ;;  %p193_p2 = scmp.lt.s32.totalorder %s1316_s17, 3 }
   0x5   : > { %s1718_s18 = smov (%p28_p1, %s26_s18), 0  ;;  %p194_p3 = pnand %p1105_p0, %p193_p2 }
   0x6   : > { %p232_p4 = scmp.lt.s32.totalorder (!%p194_p3), %s1308_s15, 1 }
   0x7   : > { %197 = sbr.rel (%p194_p3) target bundleno = 366 (0x16e), region = 36 }
   0xc   : > { %v1366_v0 = vld [vmem:[%s1712_s2] sm:$0xff]  ;;  %s1720_s15 = smov (!%p232_p4, %s1308_s15), 1  ;;  %v1318_v1 = vmov 0   ;;  %v321_v3 = vld [vmem:[%s1713_s3 + $0x10] sm:$0xff]  ;;  %v320_v4 = vld [vmem:[%s1713_s3 + $0x8] sm:$0xff] }
   0xd   : > { %1144 = vmatprep.mubr.f32.mxu0 %v1366_v0  ;;  %1240 = vmatprep.mubr.f32.mxu1 %v1366_v0  ;;  %v319_v2 = vld [vmem:[%s1713_s3] sm:$0xff]  ;;  %s1264_s25 = smul.u32 384, %s1720_s15  ;;  %s1111_s28 = sshll.u32 %s1720_s15, 7  ;;  %v322_v5 = vld [vmem:[%s1713_s3 + $0x18] sm:$0xff]  ;;  %v324_v27 = vld [vmem:[%s1713_s3 + $0x28] sm:$0xff] }
   0xe   : > { %1292 = vset.pattern.permute.xlu0 %v1318_v1  ;;  %1293 = vset.pattern.permute.xlu1 %v1318_v1  ;;  %s1386_s5 = scalar_lea.vmem %s1711_s1, %s1111_s28  ;;  %v323_v16 = vld [vmem:[%s1713_s3 + $0x20] sm:$0xff]  ;;  %v325_v32 = vld [vmem:[%s1713_s3 + $0x30] sm:$0xff]  ;;  %v326_v37 = vld [vmem:[%s1713_s3 + $0x38] sm:$0xff]  ;;  %s1265_s26 = smul.u32 3, %s1720_s15 }
   0xf   : > { %337 = vperm.xlu0 %1292, %v319_v2   ;;  %347 = vperm.xlu1 %1293, %v321_v3   ;;  %s1391_s8 = scalar_lea.vmem %s1710_s0, %s1264_s25  ;;  %v769_v11 = vld [vmem:[%s1386_s5] sm:$0xff]  ;;  %v770_v15 = vld [vmem:[%s1386_s5 + $0x8] sm:$0xff]  ;;  %v771_v26 = vld [vmem:[%s1386_s5 + $0x10] sm:$0xff] }
  0x10   : > { %v302_v6 = vld [vmem:[%s1391_s8 + $0xf8] sm:$0xff]  ;;  %v301_v9 = vld [vmem:[%s1391_s8 + $0xf0] sm:$0xff]  ;;  %v300_v13 = vld [vmem:[%s1391_s8 + $0xe8] sm:$0xff]  ;;  %s253_s28 = scalar_lea.vmem %s1714_s4, %s1265_s26 }
  0x11   : > { %v318_v7 = vld [vmem:[%s1391_s8 + $0x178] sm:$0xff]  ;;  %1112 = vmatprep.subr.mxu0 %v302_v6  ;;  %v317_v10 = vld [vmem:[%s1391_s8 + $0x170] sm:$0xff]  ;;  %v316_v14 = vld [vmem:[%s1391_s8 + $0x168] sm:$0xff] }
  0x12   : > { %v286_v8 = vld [vmem:[%s1391_s8 + $0x78] sm:$0xff]  ;;  %1208 = vmatprep.subr.mxu1 %v318_v7  ;;  %v285_v12 = vld [vmem:[%s1391_s8 + $0x70] sm:$0xff]  ;;  %v284_v17 = vld [vmem:[%s1391_s8 + $0x68] sm:$0xff] }
  0x13   : > { %342 = vperm.xlu0 %1292, %v320_v4   ;;  %1113 = vmatpush3.xpose.msra.mxu0 %v286_v8  ;;  %v299_v18 = vld [vmem:[%s1391_s8 + $0xe0] sm:$0xff]  ;;  %v298_v21 = vld [vmem:[%s1391_s8 + $0xd8] sm:$0xff]  ;;  %v297_v24 = vld [vmem:[%s1391_s8 + $0xd0] sm:$0xff] }
  0x14   : > { %1209 = vmatpush3.xpose.msra.mxu1 %v318_v7  ;;  %1114 = vmatprep.subr.mxu0 %v301_v9  ;;  %v315_v19 = vld [vmem:[%s1391_s8 + $0x160] sm:$0xff]  ;;  %v314_v22 = vld [vmem:[%s1391_s8 + $0x158] sm:$0xff]  ;;  %v313_v25 = vld [vmem:[%s1391_s8 + $0x150] sm:$0xff] }
  0x15   : > { %1210 = vmatprep.subr.mxu1 %v317_v10  ;;  %352 = vperm.xlu1 %1293, %v322_v5   ;;  %v283_v20 = vld [vmem:[%s1391_s8 + $0x60] sm:$0xff]  ;;  %v282_v23 = vld [vmem:[%s1391_s8 + $0x58] sm:$0xff]  ;;  %v281_v29 = vld [vmem:[%s1391_s8 + $0x50] sm:$0xff] }
  0x16   : > { %v772_v28 = vld [vmem:[%s1386_s5 + $0x18] sm:$0xff]  ;;  %v296_v30 = vld [vmem:[%s1391_s8 + $0xc8] sm:$0xff]  ;;  %v773_v33 = vld [vmem:[%s1386_s5 + $0x20] sm:$0xff] }
  0x17   : > { %787 = vperm.xlu0 %1292, %v769_v11   ;;  %1115 = vmatpush3.xpose.msra.mxu0 %v285_v12  ;;  %v312_v31 = vld [vmem:[%s1391_s8 + $0x148] sm:$0xff]  ;;  %v295_v35 = vld [vmem:[%s1391_s8 + $0xc0] sm:$0xff]  ;;  %v294_v40 = vld [vmem:[%s1391_s8 + $0xb8] sm:$0xff] }
  0x18   : > { %1211 = vmatpush3.xpose.msra.mxu1 %v317_v10  ;;  %1116 = vmatprep.subr.mxu0 %v300_v13  ;;  %v280_v34 = vld [vmem:[%s1391_s8 + $0x48] sm:$0xff]  ;;  %v311_v36 = vld [vmem:[%s1391_s8 + $0x140] sm:$0xff]  ;;  %v310_v41 = vld [vmem:[%s1391_s8 + $0x138] sm:$0xff] }
  0x19   : > { %1212 = vmatprep.subr.mxu1 %v316_v14  ;;  %792 = vperm.xlu1 %1293, %v770_v15   ;;  %v774_v38 = vld [vmem:[%s1386_s5 + $0x28] sm:$0xff]  ;;  %v279_v39 = vld [vmem:[%s1391_s8 + $0x40] sm:$0xff]  ;;  %v775_v43 = vld [vmem:[%s1386_s5 + $0x30] sm:$0xff] }
  0x1a   : > { %v327_v42 = vld [vmem:[%s1713_s3 + $0x40] sm:$0xff]  ;;  %v278_v44 = vld [vmem:[%s1391_s8 + $0x38] sm:$0xff]  ;;  %v293_v45 = vld [vmem:[%s1391_s8 + $0xb0] sm:$0xff] }
  0x1b   : > { %357 = vperm.xlu0 %1292, %v323_v16   ;;  %1117 = vmatpush3.xpose.msra.mxu0 %v284_v17  ;;  %v309_v46 = vld [vmem:[%s1391_s8 + $0x130] sm:$0xff]  ;;  %v328_v47 = vld [vmem:[%s1713_s3 + $0x48] sm:$0xff]  ;;  %v776_v48 = vld [vmem:[%s1386_s5 + $0x38] sm:$0xff] }
  0x1c   : > { %1213 = vmatpush3.xpose.msra.mxu1 %v316_v14  ;;  %1118 = vmatprep.subr.mxu0 %v299_v18  ;;  %v277_v49 = vld [vmem:[%s1391_s8 + $0x30] sm:$0xff]  ;;  %v292_v50 = vld [vmem:[%s1391_s8 + $0xa8] sm:$0xff]  ;;  %v777_v53 = vld [vmem:[%s1386_s5 + $0x40] sm:$0xff] }
  0x1d   : > { %1214 = vmatprep.subr.mxu1 %v315_v19  ;;  %797 = vperm.xlu1 %1293, %v771_v26   ;;  %v308_v51 = vld [vmem:[%s1391_s8 + $0x128] sm:$0xff]  ;;  %v329_v52 = vld [vmem:[%s1713_s3 + $0x50] sm:$0xff]  ;;  %v291_v55 = vld [vmem:[%s1391_s8 + $0xa0] sm:$0xff] }
  0x1e   : > { %v276_v54 = vld [vmem:[%s1391_s8 + $0x28] sm:$0xff]  ;;  %v307_v56 = vld [vmem:[%s1391_s8 + $0x120] sm:$0xff]  ;;  %v330_v57 = vld [vmem:[%s1713_s3 + $0x58] sm:$0xff] }
  0x1f   : > { %1119 = vmatpush3.xpose.msra.mxu0 %v283_v20  ;;  %362 = vperm.xlu0 %1292, %v324_v27   ;;  %v778_v58 = vld [vmem:[%s1386_s5 + $0x48] sm:$0xff]  ;;  %v275_v59 = vld [vmem:[%s1391_s8 + $0x20] sm:$0xff]  ;;  %v290_v60 = vld [vmem:[%s1391_s8 + $0x98] sm:$0xff] }
  0x20   : > { %1215 = vmatpush3.xpose.msra.mxu1 %v315_v19  ;;  %1120 = vmatprep.subr.mxu0 %v298_v21  ;;  %v306_v61 = vld [vmem:[%s1391_s8 + $0x118] sm:$0xff]  ;;  %v331_v62 = vld [vmem:[%s1713_s3 + $0x60] sm:$0xff]  ;;  %v779_v63 = vld [vmem:[%s1386_s5 + $0x50] sm:$0xff] }
  0x21   : > { %1216 = vmatprep.subr.mxu1 %v314_v22  ;;  %802 = vperm.xlu1 %1293, %v772_v28   ;;  %v274_v1 = vld [vmem:[%s1391_s8 + $0x18] sm:$0xff]  ;;  %v289_v2 = vld [vmem:[%s1391_s8 + $0x90] sm:$0xff]  ;;  %v332_v4 = vld [vmem:[%s1713_s3 + $0x68] sm:$0xff] }
  0x22   : > { %v305_v3 = vld [vmem:[%s1391_s8 + $0x110] sm:$0xff]  ;;  %v780_v5 = vld [vmem:[%s1386_s5 + $0x58] sm:$0xff]  ;;  %v288_v7 = vld [vmem:[%s1391_s8 + $0x88] sm:$0xff] }
  0x23   : > { %1121 = vmatpush3.xpose.msra.mxu0 %v282_v23  ;;  %367 = vperm.xlu0 %1292, %v325_v32   ;;  %v273_v6 = vld [vmem:[%s1391_s8 + $0x10] sm:$0xff]  ;;  %v304_v8 = vld [vmem:[%s1391_s8 + $0x108] sm:$0xff]  ;;  %v781_v10 = vld [vmem:[%s1386_s5 + $0x60] sm:$0xff] }
  0x24   : > { %1217 = vmatpush3.xpose.msra.mxu1 %v314_v22  ;;  %1122 = vmatprep.subr.mxu0 %v297_v24  ;;  %v333_v9 = vld [vmem:[%s1713_s3 + $0x70] sm:$0xff]  ;;  %v272_v11 = vld [vmem:[%s1391_s8 + $0x8] sm:$0xff]  ;;  %v287_v12 = vld [vmem:[%s1391_s8 + $0x80] sm:$0xff] }
  0x25   : > { %1218 = vmatprep.subr.mxu1 %v313_v25  ;;  %807 = vperm.xlu1 %1293, %v773_v33   ;;  %v303_v13 = vld [vmem:[%s1391_s8 + $0x100] sm:$0xff]  ;;  %v334_v14 = vld [vmem:[%s1713_s3 + $0x78] sm:$0xff]  ;;  %v782_v15 = vld [vmem:[%s1386_s5 + $0x68] sm:$0xff] }
  0x26   : > { %v271_v16 = vld [vmem:[%s1391_s8] sm:$0xff]  ;;  %v783_v17 = vld [vmem:[%s1386_s5 + $0x70] sm:$0xff]  ;;  %v256_v18 = vld [vmem:[%s1712_s2 + $0x8] sm:$0xff] }
  0x27   : > { %1123 = vmatpush3.xpose.msra.mxu0 %v281_v29  ;;  %372 = vperm.xlu0 %1292, %v326_v37   ;;  %v257_v19 = vld [vmem:[%s1712_s2 + $0x10] sm:$0xff]  ;;  %v784_v20 = vld [vmem:[%s1386_s5 + $0x78] sm:$0xff]  ;;  %v259_v22 = vld [vmem:[%s1712_s2 + $0x20] sm:$0xff] }
  0x28   : > { %1219 = vmatpush3.xpose.msra.mxu1 %v313_v25  ;;  %1124 = vmatprep.subr.mxu0 %v296_v30  ;;  %v258_v21 = vld [vmem:[%s1712_s2 + $0x18] sm:$0xff]  ;;  %v261_v23 = vld [vmem:[%s1712_s2 + $0x30] sm:$0xff]  ;;  %v263_v25 = vld [vmem:[%s1712_s2 + $0x40] sm:$0xff] }
  0x29   : > { %1220 = vmatprep.subr.mxu1 %v312_v31  ;;  %812 = vperm.xlu1 %1293, %v774_v38   ;;  %v262_v24 = vld [vmem:[%s1712_s2 + $0x38] sm:$0xff]  ;;  %v264_v26 = vld [vmem:[%s1712_s2 + $0x48] sm:$0xff]  ;;  %v265_v27 = vld [vmem:[%s1712_s2 + $0x50] sm:$0xff] }
  0x2a   : > { %v266_v28 = vld [vmem:[%s1712_s2 + $0x58] sm:$0xff]  ;;  %v267_v29 = vld [vmem:[%s1712_s2 + $0x60] sm:$0xff]  ;;  %v268_v30 = vld [vmem:[%s1712_s2 + $0x68] sm:$0xff] }
  0x2b   : > { %1125 = vmatpush3.xpose.msra.mxu0 %v280_v34  ;;  %377 = vperm.xlu0 %1292, %v327_v42   ;;  %v270_v32 = vld [vmem:[%s1712_s2 + $0x78] sm:$0xff] }
  0x2c   : > { %1221 = vmatpush3.xpose.msra.mxu1 %v312_v31  ;;  %1126 = vmatprep.subr.mxu0 %v295_v35  ;;  %v269_v31 = vld [vmem:[%s1712_s2 + $0x70] sm:$0xff] }
  0x2d   : > { %1222 = vmatprep.subr.mxu1 %v311_v36  ;;  %817 = vperm.xlu1 %1293, %v775_v43  }
  0x2f   : > { %1127 = vmatpush3.xpose.msra.mxu0 %v279_v39  ;;  %382 = vperm.xlu0 %1292, %v328_v47  }
  0x30   : > { %1223 = vmatpush3.xpose.msra.mxu1 %v311_v36  ;;  %1128 = vmatprep.subr.mxu0 %v294_v40 }
  0x31   : > { %1224 = vmatprep.subr.mxu1 %v310_v41  ;;  %822 = vperm.xlu1 %1293, %v776_v48  }
  0x33   : > { %1129 = vmatpush3.xpose.msra.mxu0 %v278_v44  ;;  %387 = vperm.xlu0 %1292, %v329_v52  }
  0x34   : > { %1225 = vmatpush3.xpose.msra.mxu1 %v310_v41  ;;  %1130 = vmatprep.subr.mxu0 %v293_v45 }
  0x35   : > { %1226 = vmatprep.subr.mxu1 %v309_v46  ;;  %827 = vperm.xlu1 %1293, %v777_v53  }
  0x37   : > { %1131 = vmatpush3.xpose.msra.mxu0 %v277_v49  ;;  %392 = vperm.xlu0 %1292, %v330_v57  }
  0x38   : > { %1227 = vmatpush3.xpose.msra.mxu1 %v309_v46  ;;  %1132 = vmatprep.subr.mxu0 %v292_v50 }
  0x39   : > { %1228 = vmatprep.subr.mxu1 %v308_v51  ;;  %832 = vperm.xlu1 %1293, %v778_v58  }
  0x3b   : > { %1133 = vmatpush3.xpose.msra.mxu0 %v276_v54  ;;  %397 = vperm.xlu0 %1292, %v331_v62  }
  0x3c   : > { %1229 = vmatpush3.xpose.msra.mxu1 %v308_v51  ;;  %1134 = vmatprep.subr.mxu0 %v291_v55 }
  0x3d   : > { %1230 = vmatprep.subr.mxu1 %v307_v56  ;;  %837 = vperm.xlu1 %1293, %v779_v63  }
  0x3f   : > { %1135 = vmatpush3.xpose.msra.mxu0 %v275_v59  ;;  %402 = vperm.xlu0 %1292, %v332_v4  }
  0x40   : > { %1231 = vmatpush3.xpose.msra.mxu1 %v307_v56  ;;  %1136 = vmatprep.subr.mxu0 %v290_v60 }
  0x41   : > { %1232 = vmatprep.subr.mxu1 %v306_v61  ;;  %842 = vperm.xlu1 %1293, %v780_v5  }
  0x43   : > { %1137 = vmatpush3.xpose.msra.mxu0 %v274_v1  ;;  %407 = vperm.xlu0 %1292, %v333_v9  }
  0x44   : > { %1233 = vmatpush3.xpose.msra.mxu1 %v306_v61  ;;  %1138 = vmatprep.subr.mxu0 %v289_v2 }
  0x45   : > { %1234 = vmatprep.subr.mxu1 %v305_v3  ;;  %847 = vperm.xlu1 %1293, %v781_v10  }
  0x47   : > { %1139 = vmatpush3.xpose.msra.mxu0 %v273_v6  ;;  %412 = vperm.xlu0 %1292, %v334_v14  }
  0x48   : > { %1235 = vmatpush3.xpose.msra.mxu1 %v305_v3  ;;  %1140 = vmatprep.subr.mxu0 %v288_v7 }
  0x49   : > { %1236 = vmatprep.subr.mxu1 %v304_v8  ;;  %852 = vperm.xlu1 %1293, %v782_v15  }
  0x4b   : > { %1141 = vmatpush3.xpose.msra.mxu0 %v272_v11  ;;  %857 = vperm.xlu0 %1292, %v783_v17  }
  0x4c   : > { %1237 = vmatpush3.xpose.msra.mxu1 %v304_v8  ;;  %1142 = vmatprep.subr.mxu0 %v287_v12 }
  0x4d   : > { %1238 = vmatprep.subr.mxu1 %v303_v13  ;;  %862 = vperm.xlu1 %1293, %v784_v20  }
  0x4f   : > { %1143 = vmatpush3.xpose.msra.mxu0 %v271_v16 }
  0x50   : > { %1239 = vmatpush3.xpose.msra.mxu1 %v303_v13 }
  0x52   : > { %1145 = vmatmul.mubr.f32.vlgmr.msra.gmra.mxu0 %v1366_v0  ;;  %v260_v0 = vld [vmem:[%s1712_s2 + $0x28] sm:$0xff] }
  0x53   : > { %1241 = vmatmul.mubr.f32.vlgmr.msra.gmra.mxu1 %v256_v18  ;;  %1146 = vmatprep.mubr.f32.mxu0 %v256_v18 }
  0x54   : > { %1243 = vmatprep.mubr.f32.mxu1 %v257_v19 }
  0x56   : > { %1147 = vmatmul.mubr.f32.gmra.mxu0 %v256_v18 }
  0x57   : > { %1244 = vmatmul.mubr.f32.gmra.mxu1 %v258_v21  ;;  %1148 = vmatprep.mubr.f32.mxu0 %v257_v19 }
  0x58   : > { %1246 = vmatprep.mubr.f32.mxu1 %v259_v22 }
  0x5a   : > { %1149 = vmatmul.mubr.f32.gmra.mxu0 %v257_v19 }
  0x5b   : > { %1247 = vmatmul.mubr.f32.gmra.mxu1 %v260_v0  ;;  %1150 = vmatprep.mubr.f32.mxu0 %v258_v21 }
  0x5c   : > { %1249 = vmatprep.mubr.f32.mxu1 %v261_v23 }
  0x5e   : > { %1151 = vmatmul.mubr.f32.gmra.mxu0 %v258_v21 }
  0x5f   : > { %1250 = vmatmul.mubr.f32.gmra.mxu1 %v262_v24  ;;  %1152 = vmatprep.mubr.f32.mxu0 %v259_v22 }
  0x60   : > { %1252 = vmatprep.mubr.f32.mxu1 %v263_v25 }
  0x62   : > { %1153 = vmatmul.mubr.f32.gmra.mxu0 %v259_v22 }
  0x63   : > { %1253 = vmatmul.mubr.f32.gmra.mxu1 %v264_v26  ;;  %1154 = vmatprep.mubr.f32.mxu0 %v260_v0 }
  0x64   : > { %1255 = vmatprep.mubr.f32.mxu1 %v265_v27 }
  0x66   : > { %1155 = vmatmul.mubr.f32.gmra.mxu0 %v260_v0 }
  0x67   : > { %1256 = vmatmul.mubr.f32.gmra.mxu1 %v266_v28  ;;  %1156 = vmatprep.mubr.f32.mxu0 %v261_v23 }
  0x68   : > { %1258 = vmatprep.mubr.f32.mxu1 %v267_v29 }
  0x6a   : > { %1157 = vmatmul.mubr.f32.gmra.mxu0 %v261_v23 }
  0x6b   : > { %1259 = vmatmul.mubr.f32.gmra.mxu1 %v268_v30  ;;  %1158 = vmatprep.mubr.f32.mxu0 %v262_v24 }
  0x6c   : > { %1261 = vmatprep.mubr.f32.mxu1 %v269_v31 }
  0x6e   : > { %1159 = vmatmul.mubr.f32.gmra.mxu0 %v262_v24 }
  0x6f   : > { %1262 = vmatmul.mubr.f32.gmra.mxu1 %v270_v32  ;;  %1160 = vmatprep.mubr.f32.mxu0 %v263_v25 }
  0x72   : > { %1161 = vmatmul.mubr.f32.gmra.mxu0 %v263_v25 }
  0x73   : > { %1162 = vmatprep.mubr.f32.mxu0 %v264_v26 }
  0x76   : > { %1163 = vmatmul.mubr.f32.gmra.mxu0 %v264_v26 }
  0x77   : > { %1164 = vmatprep.mubr.f32.mxu0 %v265_v27 }
  0x7a   : > { %1165 = vmatmul.mubr.f32.gmra.mxu0 %v265_v27 }
  0x7b   : > { %1166 = vmatprep.mubr.f32.mxu0 %v266_v28 }
  0x7e   : > { %1167 = vmatmul.mubr.f32.gmra.mxu0 %v266_v28 }
  0x7f   : > { %1168 = vmatprep.mubr.f32.mxu0 %v267_v29 }
  0x82   : > { %1169 = vmatmul.mubr.f32.gmra.mxu0 %v267_v29 }
  0x83   : > { %1170 = vmatprep.mubr.f32.mxu0 %v268_v30 }
  0x86   : > { %1171 = vmatmul.mubr.f32.gmra.mxu0 %v268_v30 }
  0x87   : > { %1172 = vmatprep.mubr.f32.mxu0 %v269_v31 }
  0x8a   : > { %1173 = vmatmul.mubr.f32.gmra.mxu0 %v269_v31  ;;  %v1542_v33 = vpop.permute.xlu0 %337  ;;  %v1544_v34 = vpop.permute.xlu1 %347 }
  0x8b   : > { %1174 = vmatprep.mubr.f32.mxu0 %v270_v32 }
  0x8e   : > { %1175 = vmatmul.mubr.f32.gmra.mxu0 %v270_v32  ;;  %v1546_v35 = vpop.permute.xlu0 %342 }
  0x90   : > { %v1548_v36 = vpop.permute.xlu1 %352 }
  0x92   : > { %v1550_v37 = vpop.permute.xlu0 %787 }
  0x94   : > { %v1552_v38 = vpop.permute.xlu1 %792 }
  0x96   : > { %v1554_v39 = vpop.permute.xlu0 %357 }
  0x98   : > { %v1556_v40 = vpop.permute.xlu1 %797 }
  0x9a   : > { %v1558_v41 = vpop.permute.xlu0 %362 }
  0x9c   : > { %v1560_v42 = vpop.permute.xlu1 %802 }
  0x9e   : > { %v1562_v43 = vpop.permute.xlu0 %367 }
  0xa0   : > { %v1564_v44 = vpop.permute.xlu1 %807 }
  0xa2   : > { %v1566_v45 = vpop.permute.xlu0 %372 }
  0xa4   : > { %v1568_v46 = vpop.permute.xlu1 %812 }
  0xa6   : > { %v1570_v47 = vpop.permute.xlu0 %377 }
  0xa8   : > { %v1572_v50 = vpop.permute.xlu1 %817 }
  0xaa   : > { %v1575_v54 = vpop.permute.xlu0 %382 }
  0xac   : > { %v1579_v63 = vpop.permute.xlu1 %822 }
  0xae   : > { %v1584_v6 = vpop.permute.xlu0 %387 }
  0xb0   : > { %v1589_v17 = vpop.permute.xlu1 %827 }
  0xb2   : > { %v1593_v24 = vpop.permute.xlu0 %392 }
 0x112   : > { %v481_v48 = vpop.f32.mrf.mxu0 }
 0x113   : > { %v1242_v49 = vpop.f32.mrf.mxu1 }
 0x114   : > { %v648_v51 = vadd.f32 %v1242_v49, %v1546_v35  ;;  %v483_v52 = vpop.f32.mrf.mxu0 }
 0x115   : > { %v642_v53 = vpop.f32.mrf.mxu1 }
 0x116   : > { %v726_v55 = vmax.f32 %v648_v51, 0.0  ;;  %v643_v56 = vadd.f32 %v642_v53, %v1542_v33  ;;  %v487_v57 = vpop.f32.mrf.mxu0 }
 0x117   : > { %v1245_v58 = vpop.f32.mrf.mxu1  ;;  %v488_v30 = vadd.f32 %v487_v57, %v1546_v35  ;;  %v484_v57 = vadd.f32 %v483_v52, %v1542_v33 }
 0x118   : > { %v723_v59 = vmax.f32 %v643_v56, 0.0  ;;  %v658_v60 = vadd.f32 %v1245_v58, %v1548_v36  ;;  %v489_v61 = vpop.f32.mrf.mxu0  ;;  %v870_v1 = vmul.f32 %v1552_v38, %v726_v55  ;;  %v1599_v56 = vpop.permute.xlu1 %832  ;;  %v482_v58 = vadd.f32 %v481_v48, %v1542_v33 }
 0x119   : > { %v652_v62 = vpop.f32.mrf.mxu1 }
 0x11a   : > { %v867_v2 = vmul.f32 %v1550_v37, %v723_v59  ;;  %v653_v3 = vadd.f32 %v652_v62, %v1544_v34  ;;  %v493_v4 = vpop.f32.mrf.mxu0  ;;  %v732_v7 = vmax.f32 %v658_v60, 0.0 }
 0x11b   : > { %v1248_v5 = vpop.f32.mrf.mxu1 }
 0x11c   : > { %v729_v8 = vmax.f32 %v653_v3, 0.0  ;;  %v668_v9 = vadd.f32 %v1248_v5, %v1558_v41  ;;  %v495_v10 = vpop.f32.mrf.mxu0  ;;  %v955_v12 = vadd.f32 %v870_v1, %v867_v2  ;;  %v876_v18 = vmul.f32 %v1560_v42, %v732_v7  ;;  %v1604_v3 = vpop.permute.xlu0 %397 }
 0x11d   : > { %v662_v11 = vpop.f32.mrf.mxu1  ;;  %v724_v5 = vmax.f32 %v488_v30, 0.0  ;;  %v490_v7 = vadd.f32 %v489_v61, %v1546_v35 }
 0x11e   : > { %v873_v13 = vmul.f32 %v1556_v40, %v729_v8  ;;  %v663_v14 = vadd.f32 %v662_v11, %v1554_v39  ;;  %v499_v15 = vpop.f32.mrf.mxu0  ;;  %v738_v20 = vmax.f32 %v668_v9, 0.0  ;;  %v494_v9 = vadd.f32 %v493_v4, %v1544_v34 }
 0x11f   : > { %v1251_v16 = vpop.f32.mrf.mxu1  ;;  %v500_v33 = vadd.f32 %v499_v15, %v1548_v36  ;;  %v722_v4 = vmax.f32 %v484_v57, 0.0 }
 0x120   : > { %v956_v19 = vadd.f32 %v955_v12, %v873_v13  ;;  %v735_v21 = vmax.f32 %v663_v14, 0.0  ;;  %v678_v22 = vadd.f32 %v1251_v16, %v1566_v45  ;;  %v501_v0 = vpop.f32.mrf.mxu0  ;;  %v882_v31 = vmul.f32 %v1568_v46, %v738_v20 }
 0x121   : > { %v672_v23 = vpop.f32.mrf.mxu1  ;;  %v496_v16 = vadd.f32 %v495_v10, %v1544_v34  ;;  %v1618_v34 = vpop.permute.xlu0 %402 }
 0x122   : > { %v957_v25 = vadd.f32 %v956_v19, %v876_v18  ;;  %v879_v26 = vmul.f32 %v1564_v44, %v735_v21  ;;  %v673_v27 = vadd.f32 %v672_v23, %v1562_v43  ;;  %v505_v28 = vpop.f32.mrf.mxu0  ;;  %v744_v49 = vmax.f32 %v678_v22, 0.0  ;;  %v1615_v21 = vpop.permute.xlu1 %837 }
 0x123   : > { %v1254_v29 = vpop.f32.mrf.mxu1  ;;  %v721_v19 = vmax.f32 %v482_v58, 0.0  ;;  %v725_v22 = vmax.f32 %v490_v7, 0.0  ;;  %v728_v10 = vmax.f32 %v496_v16, 0.0  ;;  %v866_v58 = vmul.f32 %v1550_v37, %v722_v4 }
 0x124   : > { %v958_v32 = vadd.f32 %v957_v25, %v879_v26  ;;  %v741_v51 = vmax.f32 %v673_v27, 0.0  ;;  %v507_v53 = vpop.f32.mrf.mxu0  ;;  %v688_v8 = vadd.f32 %v1254_v29, %v1575_v54  ;;  %v888_v48 = vmul.f32 %v1579_v63, %v744_v49 }
 0x125   : > { %v682_v55 = vpop.f32.mrf.mxu1  ;;  %v868_v25 = vmul.f32 %v1552_v38, %v724_v5  ;;  %v727_v26 = vmax.f32 %v494_v9, 0.0  ;;  %v865_v15 = vmul.f32 %v1550_v37, %v721_v19  ;;  %v506_v49 = vadd.f32 %v505_v28, %v1554_v39  ;;  %v1637_v16 = vpop.permute.xlu0 %407 }
 0x126   : > { %v885_v59 = vmul.f32 %v1572_v50, %v741_v51  ;;  %v959_v60 = vadd.f32 %v958_v32, %v882_v31  ;;  %v683_v62 = vadd.f32 %v682_v55, %v1570_v47  ;;  %v511_v1 = vpop.f32.mrf.mxu0  ;;  %v750_v23 = vmax.f32 %v688_v8, 0.0 }
 0x127   : > { %v1257_v2 = vpop.f32.mrf.mxu1  ;;  %v730_v31 = vmax.f32 %v500_v33, 0.0  ;;  %v502_v32 = vadd.f32 %v501_v0, %v1548_v36  ;;  %v913_v57 = vadd.f32 %v868_v25, %v865_v15  ;;  %v871_v5 = vmul.f32 %v1556_v40, %v727_v26  ;;  %v1630_v0 = vpop.permute.xlu1 %842 }
 0x128   : > { %v960_v11 = vadd.f32 %v959_v60, %v885_v59  ;;  %v747_v12 = vmax.f32 %v683_v62, 0.0  ;;  %v513_v13 = vpop.f32.mrf.mxu0  ;;  %v869_v59 = vmul.f32 %v1552_v38, %v725_v22  ;;  %v894_v60 = vmul.f32 %v1599_v56, %v750_v23 }
 0x129   : > { %v692_v14 = vpop.f32.mrf.mxu1  ;;  %v698_v62 = vadd.f32 %v1257_v2, %v1593_v24  ;;  %v508_v7 = vadd.f32 %v507_v53, %v1554_v39  ;;  %v512_v8 = vadd.f32 %v511_v1, %v1558_v41  ;;  %v872_v28 = vmul.f32 %v1556_v40, %v728_v10 }
 0x12a   : > { %v693_v18 = vadd.f32 %v692_v14, %v1584_v6  ;;  %v891_v52 = vmul.f32 %v1589_v17, %v747_v12  ;;  %v961_v35 = vadd.f32 %v960_v11, %v888_v48  ;;  %v517_v61 = vpop.f32.mrf.mxu0  ;;  %v874_v48 = vmul.f32 %v1560_v42, %v730_v31 }
 0x12b   : > { %v1260_v20 = vpop.f32.mrf.mxu1  ;;  %v731_v2 = vmax.f32 %v502_v32, 0.0  ;;  %v733_v11 = vmax.f32 %v506_v49, 0.0  ;;  %v514_v12 = vadd.f32 %v513_v13, %v1558_v41  ;;  %v934_v53 = vadd.f32 %v869_v59, %v866_v58  ;;  %v1646_v31 = vpop.permute.xlu1 %847 }
 0x12c   : > { %v519_v27 = vpop.f32.mrf.mxu0  ;;  %v962_v29 = vadd.f32 %v961_v35, %v891_v52  ;;  %v753_v30 = vmax.f32 %v693_v18, 0.0  ;;  %v756_v1 = vmax.f32 %v698_v62, 0.0  ;;  %v914_v18 = vadd.f32 %v913_v57, %v871_v5 }
 0x12d   : > { %v702_v51 = vpop.f32.mrf.mxu1  ;;  %v734_v19 = vmax.f32 %v508_v7, 0.0  ;;  %v736_v40 = vmax.f32 %v512_v8, 0.0  ;;  %v518_v33 = vadd.f32 %v517_v61, %v1562_v43  ;;  %v935_v35 = vadd.f32 %v934_v53, %v872_v28 }
 0x12e   : > { %v523_v55 = vpop.f32.mrf.mxu0  ;;  %v897_v37 = vmul.f32 %v1615_v21, %v753_v30  ;;  %v963_v9 = vadd.f32 %v962_v29, %v894_v60  ;;  %v703_v38 = vadd.f32 %v702_v51, %v1604_v3  ;;  %v915_v23 = vadd.f32 %v914_v18, %v874_v48 }
 0x12f   : > { %v1263_v14 = vpop.f32.mrf.mxu1  ;;  %v875_v25 = vmul.f32 %v1560_v42, %v731_v2  ;;  %v877_v41 = vmul.f32 %v1564_v44, %v733_v11  ;;  %v737_v13 = vmax.f32 %v514_v12, 0.0  ;;  %v900_v29 = vmul.f32 %v1630_v0, %v756_v1 }
 0x130   : > { %v525_v36 = vpop.f32.mrf.mxu0  ;;  %v964_v4 = vadd.f32 %v963_v9, %v897_v37  ;;  %v759_v22 = vmax.f32 %v703_v38, 0.0  ;;  %v708_v30 = vadd.f32 %v1260_v20, %v1618_v34  ;;  %v520_v15 = vadd.f32 %v519_v27, %v1562_v43  ;;  %v1654_v43 = vpop.permute.xlu0 %412 }
 0x131   : > { %v712_v26 = vpop.f32.mrf.mxu1  ;;  %v524_v61 = vadd.f32 %v523_v55, %v1566_v45  ;;  %v878_v32 = vmul.f32 %v1564_v44, %v734_v19  ;;  %v880_v49 = vmul.f32 %v1568_v46, %v736_v40  ;;  %v739_v42 = vmax.f32 %v518_v33, 0.0 }
 0x132   : > { %v529_v39 = vpop.f32.mrf.mxu0  ;;  %v526_v51 = vadd.f32 %v525_v36, %v1566_v45  ;;  %v903_v59 = vmul.f32 %v1646_v31, %v759_v22  ;;  %v965_v60 = vadd.f32 %v964_v4, %v900_v29  ;;  %v713_v62 = vadd.f32 %v712_v26, %v1637_v16 }
 0x133   : > { %v530_v20 = vadd.f32 %v529_v39, %v1570_v47  ;;  %v936_v27 = vadd.f32 %v935_v35, %v875_v25  ;;  %v916_v55 = vadd.f32 %v915_v23, %v877_v41  ;;  %v881_v57 = vmul.f32 %v1568_v46, %v737_v13  ;;  %v1660_v39 = vpop.permute.xlu1 %852 }
 0x134   : > { %v531_v52 = vpop.f32.mrf.mxu0  ;;  %v762_v5 = vmax.f32 %v708_v30, 0.0  ;;  %v740_v7 = vmax.f32 %v520_v15, 0.0  ;;  %v742_v8 = vmax.f32 %v524_v61, 0.0  ;;  %v883_v37 = vmul.f32 %v1572_v50, %v739_v42  ;;  %v1668_v35 = vpop.permute.xlu0 %857 }
 0x135   : > { %v532_v45 = vadd.f32 %v531_v52, %v1570_v47  ;;  %v937_v36 = vadd.f32 %v936_v27, %v878_v32  ;;  %v917_v28 = vadd.f32 %v916_v55, %v880_v49  ;;  %v966_v48 = vadd.f32 %v965_v60, %v903_v59 }
 0x136   : > { %v535_v10 = vpop.f32.mrf.mxu0  ;;  %v743_v2 = vmax.f32 %v526_v51, 0.0  ;;  %v765_v11 = vmax.f32 %v713_v62, 0.0  ;;  %v745_v12 = vmax.f32 %v530_v20, 0.0  ;;  %v718_v53 = vadd.f32 %v1263_v14, %v1654_v43 }
 0x137   : > { %v536_v9 = vadd.f32 %v535_v10, %v1575_v54  ;;  %v938_v46 = vadd.f32 %v937_v36, %v881_v57  ;;  %v906_v19 = vmul.f32 %v1660_v39, %v762_v5  ;;  %v884_v40 = vmul.f32 %v1572_v50, %v740_v7  ;;  %v863_v27 = vpop.permute.xlu1 %862 }
 0x138   : > { %v537_v58 = vpop.f32.mrf.mxu0  ;;  %v886_v33 = vmul.f32 %v1579_v63, %v742_v8  ;;  %v746_v52 = vmax.f32 %v532_v45, 0.0  ;;  %v918_v4 = vadd.f32 %v917_v28, %v883_v37  ;;  %v909_v41 = vmul.f32 %v1668_v35, %v765_v11 }
 0x139   : > { %v538_v1 = vadd.f32 %v537_v58, %v1575_v54  ;;  %v748_v22 = vmax.f32 %v536_v9, 0.0  ;;  %v887_v54 = vmul.f32 %v1579_v63, %v743_v2  ;;  %v967_v13 = vadd.f32 %v966_v48, %v906_v19 }
 0x13a   : > { %v541_v44 = vpop.f32.mrf.mxu0  ;;  %v889_v26 = vmul.f32 %v1589_v17, %v745_v12  ;;  %v768_v50 = vmax.f32 %v718_v53, 0.0  ;;  %v939_v61 = vadd.f32 %v938_v46, %v884_v40  ;;  %v919_v32 = vadd.f32 %v918_v4, %v886_v33 }
 0x13b   : > { %v542_v47 = vadd.f32 %v541_v44, %v1584_v6  ;;  %v749_v10 = vmax.f32 %v538_v1, 0.0  ;;  %v892_v42 = vmul.f32 %v1599_v56, %v748_v22  ;;  %v968_v60 = vadd.f32 %v967_v13, %v909_v41 }
 0x13c   : > { %v543_v38 = vpop.f32.mrf.mxu0  ;;  %v940_v59 = vadd.f32 %v939_v61, %v887_v54  ;;  %v920_v62 = vadd.f32 %v919_v32, %v889_v26  ;;  %v912_v5 = vmul.f32 %v863_v27, %v768_v50 }
 0x13d   : > { %v544_v23 = vadd.f32 %v543_v38, %v1584_v6  ;;  %v751_v29 = vmax.f32 %v542_v47, 0.0  ;;  %v890_v6 = vmul.f32 %v1589_v17, %v746_v52 }
 0x13e   : > { %v547_v18 = vpop.f32.mrf.mxu0  ;;  %v921_v45 = vadd.f32 %v920_v62, %v892_v42 }
 0x13f   : > { %v548_v14 = vadd.f32 %v547_v18, %v1593_v24  ;;  %v752_v63 = vmax.f32 %v544_v23, 0.0  ;;  %v895_v55 = vmul.f32 %v1615_v21, %v751_v29  ;;  %v941_v7 = vadd.f32 %v940_v59, %v890_v6 }
 0x140   : > { %v549_v25 = vpop.f32.mrf.mxu0  ;;  %v1319_v59 = vmov 1966171168  }
 0x141   : > { %v550_v30 = vadd.f32 %v549_v25, %v1593_v24  ;;  %v754_v51 = vmax.f32 %v548_v14, 0.0  ;;  %v893_v24 = vmul.f32 %v1599_v56, %v749_v10  ;;  %v896_v36 = vmul.f32 %v1615_v21, %v752_v63 }
 0x142   : > { %v553_v15 = vpop.f32.mrf.mxu0  ;;  %v922_v2 = vadd.f32 %v921_v45, %v895_v55 }
 0x143   : > { %v554_v49 = vadd.f32 %v553_v15, %v1604_v3  ;;  %v755_v57 = vmax.f32 %v550_v30, 0.0  ;;  %v898_v28 = vmul.f32 %v1630_v0, %v754_v51  ;;  %v942_v48 = vadd.f32 %v941_v7, %v893_v24 }
 0x144   : > { %v555_v58 = vpop.f32.mrf.mxu0 }
 0x145   : > { %v556_v20 = vadd.f32 %v555_v58, %v1604_v3  ;;  %v757_v44 = vmax.f32 %v554_v49, 0.0  ;;  %v969_v3 = vadd.f32 %v968_v60, %v912_v5  ;;  %v899_v11 = vmul.f32 %v1630_v0, %v755_v57 }
 0x146   : > { %v559_v17 = vpop.f32.mrf.mxu0  ;;  %v943_v47 = vadd.f32 %v942_v48, %v896_v36  ;;  %v923_v21 = vadd.f32 %v922_v2, %v898_v28  ;;  %v981_v60 = vunpack.c.l.s4 %v1319_v59 }
 0x147   : > { %v560_v8 = vadd.f32 %v559_v17, %v1618_v34  ;;  %v758_v37 = vmax.f32 %v556_v20, 0.0  ;;  %v901_v12 = vmul.f32 %v1646_v31, %v757_v44  ;;  %v970_v52 = vrot.slane %v969_v3, 4 }
 0x148   : > { %v561_v9 = vpop.f32.mrf.mxu0  ;;  %v944_v4 = vadd.f32 %v943_v47, %v899_v11  ;;  %v982_v57 = vunpack.c.0.s8 %v981_v60 }
 0x149   : > { %v760_v38 = vmax.f32 %v560_v8, 0.0  ;;  %v562_v56 = vadd.f32 %v561_v9, %v1618_v34  ;;  %v902_v18 = vmul.f32 %v1646_v31, %v758_v37  ;;  %v924_v22 = vadd.f32 %v923_v21, %v901_v12 }
 0x14a   : > { %v565_v46 = vpop.f32.mrf.mxu0 }
 0x14b   : > { %v761_v53 = vmax.f32 %v562_v56, 0.0  ;;  %v566_v1 = vadd.f32 %v565_v46, %v1637_v16  ;;  %v904_v40 = vmul.f32 %v1660_v39, %v760_v38  ;;  %v945_v41 = vadd.f32 %v944_v4, %v902_v18 }
 0x14c   : > { %v567_v19 = vpop.f32.mrf.mxu0 }
 0x14d   : > { %v763_v33 = vmax.f32 %v566_v1, 0.0  ;;  %v568_v34 = vadd.f32 %v567_v19, %v1637_v16  ;;  %v905_v23 = vmul.f32 %v1660_v39, %v761_v53  ;;  %v925_v31 = vadd.f32 %v924_v22, %v904_v40 }
 0x14e   : > { %v571_v0 = vpop.f32.mrf.mxu0  ;;  %v971_v16 = vadd.f32 %v970_v52, %v969_v3 }
 0x14f   : > { %v907_v14 = vmul.f32 %v1668_v35, %v763_v33  ;;  %v764_v25 = vmax.f32 %v568_v34, 0.0  ;;  %v572_v54 = vadd.f32 %v571_v0, %v1654_v43  ;;  %v946_v29 = vadd.f32 %v945_v41, %v905_v23 }
 0x150   : > { %v573_v13 = vpop.f32.mrf.mxu0  ;;  %v972_v49 = vrot.slane %v971_v16, 2 }
 0x151   : > { %v908_v26 = vmul.f32 %v1668_v35, %v764_v25  ;;  %v766_v50 = vmax.f32 %v572_v54, 0.0  ;;  %v574_v10 = vadd.f32 %v573_v13, %v1654_v43  ;;  %v926_v30 = vadd.f32 %v925_v31, %v907_v14 }
 0x152   : > { %v973_v62 = vadd.f32 %v972_v49, %v971_v16  ;;  %v983_v35 = vlaneseq }
 0x153   : > { %v910_v15 = vmul.f32 %v863_v27, %v766_v50  ;;  %v767_v61 = vmax.f32 %v574_v10, 0.0  ;;  %v947_v32 = vadd.f32 %v946_v29, %v908_v26 }
 0x154   : > { %v974_v44 = vrot.slane %v973_v62, 1  ;;  %v984_v17 = vshrl.u32 %v983_v35, 7  ;;  %vm1005_vm0 = vcmp.lt.s32.totalorder %v983_v35, 384 }
 0x155   : > { %v927_v39 = vadd.f32 %v926_v30, %v910_v15  ;;  %v911_v6 = vmul.f32 %v863_v27, %v767_v61 }
 0x156   : > { %v975_v8 = vadd.f32 %v974_v44, %v973_v62  ;;  %v985_v45 = vsub.s32 %v982_v57, %v984_v17 }
 0x157   : > { %v928_v42 = vrot.slane %v927_v39, 4  ;;  %v948_v63 = vadd.f32 %v947_v32, %v911_v6 }
 0x158   : > { %v993_v9 = vrot.slane %v975_v8, %v985_v45 }
 0x159   : > { %v929_v51 = vadd.f32 %v928_v42, %v927_v39  ;;  %v949_v58 = vrot.slane %v948_v63, 4 }
 0x15b   : > { %v930_v20 = vrot.slane %v929_v51, 2  ;;  %v950_v43 = vadd.f32 %v949_v58, %v948_v63 }
 0x15d   : > { %v931_v24 = vadd.f32 %v930_v20, %v929_v51  ;;  %v951_v55 = vrot.slane %v950_v43, 2 }
 0x15f   : > { %v932_v5 = vrot.slane %v931_v24, 1  ;;  %v952_v7 = vadd.f32 %v951_v55, %v950_v43 }
 0x161   : > { %v953_v27 = vrot.slane %v952_v7, 1  ;;  %v933_v36 = vadd.f32 %v932_v5, %v931_v24 }
 0x163   : > { %v954_v28 = vadd.f32 %v953_v27, %v952_v7 }
 0x165   : > { %v979_v37 = vcombine.low %v933_v36, %v954_v28 }
 0x167   : > { %v986_v3 = vrot.slane %v979_v37, %v985_v45 }
 0x169   : > { %v994_v38 = vcombine.low %v986_v3, %v993_v9 }
 0x16b   : > { %v1001_v56 = vrot.slane %v994_v38, %v985_v45 }
 0x16d   : > { %1007 = vst.msk [vmem:[%s253_s28] sm:$0x7] %vm1005_vm0, %v1001_v56 }
 0x16e PF: > { %s14_s17 = sadd.s32 1, %s1316_s17   ;;  %s1715_s15 = smov %s1312_s16 }
 0x16f   : > { %p11_p5 = scmp.ge.s32.totalorder %s14_s17, 4   ;;  %s1716_s16 = smov %s1718_s18 }
 0x171   :  { %13 = sbr.rel (!%p11_p5) target bundleno = 2 (0x2), region = 69 }

</bundles_post_ra>
